<compile_context>
chip_gen: v6e
topology: v6e:2x2x1
jax: 0.10.0
libtpu: 0.0.40
codegen_flags: <defaults>
</compile_context>

<pallas_src>
import functools

import jax
import jax.numpy as jnp
from jax.experimental import pallas as pl
from jax.experimental.pallas import tpu as pltpu


def _round_up(x: int, m: int) -> int:
    return ((x + m - 1) // m) * m


def _mlp_fused_kernel(*refs, num_linear: int):
    """refs = (x_ref, w0, b0, w1, b1, ..., w_{L-1}, b_{L-1}, o_ref).

    One batch tile per grid step; all layers applied on VMEM-resident data.
    Matmuls run in bf16 on the MXU with f32 accumulation; bias-add and ReLU
    are f32 on the VPU.
    """
    x_ref = refs[0]
    o_ref = refs[-1]
    wb = refs[1:-1]

    h = x_ref[...]                                   # bf16 activations
    for li in range(num_linear):
        w = wb[2 * li][...]                          # bf16 (D_in, D_out)
        b = wb[2 * li + 1][...]                      # f32  (1, D_out)
        acc = jnp.dot(h, w, preferred_element_type=jnp.float32) + b
        if li < num_linear - 1:                      # hidden layers: ReLU
            acc = jnp.maximum(acc, 0.0)
            h = acc.astype(w.dtype)                  # back to bf16 for next MXU
        else:                                        # head: no ReLU
            h = acc
    o_ref[...] = h.astype(o_ref.dtype)


def prepare_mlp_params(params, param_dtype=jnp.bfloat16, bias_dtype=jnp.float32):
    """One-time prepare: zero-pad every (W, b) to 128-multiples and cast.

    params: list of (W, b) with W of shape (D_in, D_out) (already transposed
    relative to nn.Linear's (out, in) storage) and b of shape (D_out,) or
    (1, D_out).  Zero-padding is exact: padded input lanes hit zero weight
    rows, padded output lanes get zero bias and are sliced off.

    Returns (flat_padded_params_tuple, true_output_dim).
    """
    padded = []
    for w, b in params:
        d_in, d_out = w.shape
        pi, po = _round_up(d_in, 128), _round_up(d_out, 128)
        wp = jnp.zeros((pi, po), param_dtype).at[:d_in, :d_out].set(
            w.astype(param_dtype))
        bp = jnp.zeros((1, po), bias_dtype).at[:, :d_out].set(
            b.reshape(1, -1).astype(bias_dtype))
        padded += [wp, bp]
    return tuple(padded), params[-1][0].shape[1]


def mlp_forward(x, padded_params, *, out_dim, batch_tile=None,
                compute_dtype=jnp.bfloat16):
    """Fused MLP forward on pre-padded params.  x: (B, ...) -> (B, out_dim)."""
    B = x.shape[0]
    x2 = x.reshape(B, -1)
    din = x2.shape[1]

    num_linear = len(padded_params) // 2
    pdims = [padded_params[0].shape[0]] + [
        padded_params[2 * li].shape[1] for li in range(num_linear)]
    pdin, pdout = pdims[0], pdims[-1]
    assert din <= pdin, "input feature dim larger than prepared params expect"

    # --- batch tile: multiple of 16 (bf16 sublane pack), up to 512 ----------
    TILE_MIN = 16
    if batch_tile is None:
        batch_tile = min(512, _round_up(B, TILE_MIN))
    else:
        batch_tile = max(TILE_MIN, _round_up(int(batch_tile), TILE_MIN))
    bp = _round_up(B, batch_tile)
    # v7x megacore: prefer >= 2 grid steps so both TensorCores get work.
    while bp // batch_tile < 2 and batch_tile > TILE_MIN:
        batch_tile = max(TILE_MIN, _round_up(batch_tile // 2, TILE_MIN))
        bp = _round_up(B, batch_tile)
    grid = (bp // batch_tile,)

    # --- input: cast to bf16; pad only if not already aligned ---------------
    if din == pdin and B == bp:
        xp = x2.astype(compute_dtype)
    else:
        xp = jnp.zeros((bp, pdin), compute_dtype).at[:B, :din].set(
            x2.astype(compute_dtype))

    # --- VMEM budget: resident weights (single-buffered) + 2x io tiles ------
    c_item = jnp.dtype(compute_dtype).itemsize
    o_item = jnp.dtype(x.dtype).itemsize
    wb_bytes = sum(int(a.size) * a.dtype.itemsize for a in padded_params)
    io_bytes = 2 * batch_tile * (pdin * c_item + pdout * o_item)
    act_bytes = batch_tile * max(pdims) * (4 + c_item)   # f32 acc + bf16 copy
    needed = wb_bytes + io_bytes + act_bytes
    vmem_limit = int(min(max(2 * needed, 16 << 20), 64 << 20))

    # --- advisory cost estimate ---------------------------------------------
    flops = 2 * bp * sum(pdims[i] * pdims[i + 1] for i in range(num_linear))
    bytes_accessed = bp * pdin * c_item + wb_bytes + bp * pdout * o_item
    cost = pl.CostEstimate(flops=flops, transcendentals=0,
                           bytes_accessed=bytes_accessed)

    # --- specs ---------------------------------------------------------------
    # x tile walks the batch grid; weights/biases are constant-indexed and
    # single-buffered so they are DMA'd once and stay VMEM-resident.
    in_specs = [pl.BlockSpec((batch_tile, pdin), lambda i: (i, 0))]
    for li in range(num_linear):
        in_specs.append(pl.BlockSpec((pdims[li], pdims[li + 1]),
                                     lambda i: (0, 0),
                                     pipeline_mode=pl.Buffered(1)))
        in_specs.append(pl.BlockSpec((1, pdims[li + 1]),
                                     lambda i: (0, 0),
                                     pipeline_mode=pl.Buffered(1)))

    kernel = functools.partial(_mlp_fused_kernel, num_linear=num_linear)

    out_padded = pl.pallas_call(
        kernel,
        out_shape=jax.ShapeDtypeStruct((bp, pdout), x.dtype),
        grid=grid,
        in_specs=in_specs,
        out_specs=pl.BlockSpec((batch_tile, pdout), lambda i: (i, 0)),
        compiler_params=pltpu.CompilerParams(
            dimension_semantics=("parallel",),
            vmem_limit_bytes=vmem_limit),
        cost_estimate=cost,
    )(xp, *padded_params)

    # Slice off batch padding and lane padding.
    return out_padded[:B, :out_dim]


def init_mlp_params(key, input_dim, hidden_dim, n_layers, output_dim,
                    dtype=jnp.float32):
    """Deterministic synthetic params mirroring nn.Linear shapes.

    Returns a list of (W, b) with W transposed to (D_in, D_out).
    """
    dims = [input_dim] + [hidden_dim] * n_layers + [output_dim]
    params = []
    for i in range(len(dims) - 1):
        d_in, d_out = dims[i], dims[i + 1]
        key, kw, kb = jax.random.split(key, 3)
        bound = 1.0 / jnp.sqrt(d_in)  # PyTorch default uniform bound
        w = jax.random.uniform(kw, (d_in, d_out), dtype, -bound, bound)
        b = jax.random.uniform(kb, (1, d_out), dtype, -bound, bound)
        params.append((w, b))
    return params


def mlp_reference(x, params):
    # Pure-JAX f32 reference for sanity checking.
    x = x.reshape(x.shape[0], -1)
    for (w, b) in params[:-1]:
        x = jnp.maximum(x @ w + b.reshape(1, -1), 0.0)
    w, b = params[-1]
    return x @ w + b.reshape(1, -1)


if __name__ == "__main__":
    # Small shapes consistent with the module: x of shape (B, C, H, W)
    # flattened to input_dim = C*H*W.
    B, C, H, W = 2, 4, 4, 4
    input_dim = C * H * W          # 64
    hidden_dim = 32
    n_layers = 2
    output_dim = 8

    key = jax.random.PRNGKey(0)
    key_x, key_p = jax.random.split(key)
    x = jax.random.normal(key_x, (B, C, H, W), jnp.float32)
    params = init_mlp_params(key_p, input_dim, hidden_dim, n_layers, output_dim)

    # One-time prepare (padding + bf16 cast hoisted out of the forward).
    prepared, out_dim = prepare_mlp_params(params)

    fwd = jax.jit(functools.partial(mlp_forward, out_dim=out_dim))
    out = fwd(x, prepared)
    out = jax.block_until_ready(out)

    ref = mlp_reference(x, params)
    assert out.shape == (B, output_dim), out.shape
    # bf16 matmul path -> loosen tolerance vs the f32 reference.
    assert jnp.allclose(out, ref, atol=2e-2, rtol=2e-2), "mismatch vs reference"

    print("KERNEL_OK")
</pallas_src>

<mosaic_0001>
module attributes {stable_mosaic.version = 11 : i64} {
  func.func @_mlp_fused_kernel(%arg0: i32, %arg1: memref<16x128xbf16, #tpu.memory_space<vmem>>, %arg2: memref<128x128xbf16, #tpu.memory_space<vmem>>, %arg3: memref<1x128xf32, #tpu.memory_space<vmem>>, %arg4: memref<128x128xbf16, #tpu.memory_space<vmem>>, %arg5: memref<1x128xf32, #tpu.memory_space<vmem>>, %arg6: memref<128x128xbf16, #tpu.memory_space<vmem>>, %arg7: memref<1x128xf32, #tpu.memory_space<vmem>>, %arg8: memref<16x128xf32, #tpu.memory_space<vmem>>) attributes {dimension_semantics = [#tpu.dimension_semantics<parallel>], iteration_bounds = array<i64: 1>, scalar_prefetch = 0 : i64, scratch_operands = 0 : i64, tpu.core_type = #tpu.core_type<tc>, window_params = [{transform_indices = @transform_0, window_bounds = array<i64: 16, 128>}, {pipeline_mode = #tpu.pipeline_mode<synchronous>, transform_indices = @transform_1, window_bounds = array<i64: 128, 128>}, {pipeline_mode = #tpu.pipeline_mode<synchronous>, transform_indices = @transform_2, window_bounds = array<i64: 1, 128>}, {pipeline_mode = #tpu.pipeline_mode<synchronous>, transform_indices = @transform_3, window_bounds = array<i64: 128, 128>}, {pipeline_mode = #tpu.pipeline_mode<synchronous>, transform_indices = @transform_4, window_bounds = array<i64: 1, 128>}, {pipeline_mode = #tpu.pipeline_mode<synchronous>, transform_indices = @transform_5, window_bounds = array<i64: 128, 128>}, {pipeline_mode = #tpu.pipeline_mode<synchronous>, transform_indices = @transform_6, window_bounds = array<i64: 1, 128>}, {transform_indices = @transform_7, window_bounds = array<i64: 16, 128>}]} {
    %c0 = arith.constant 0 : index
    %c0_0 = arith.constant 0 : index
    %0 = vector.load %arg1[%c0, %c0_0] : memref<16x128xbf16, #tpu.memory_space<vmem>>, vector<16x128xbf16>
    %c0_1 = arith.constant 0 : index
    %c0_2 = arith.constant 0 : index
    %1 = vector.load %arg2[%c0_1, %c0_2] : memref<128x128xbf16, #tpu.memory_space<vmem>>, vector<128x128xbf16>
    %c0_3 = arith.constant 0 : index
    %c0_4 = arith.constant 0 : index
    %2 = vector.load %arg3[%c0_3, %c0_4] : memref<1x128xf32, #tpu.memory_space<vmem>>, vector<1x128xf32>
    %cst = arith.constant dense<0.000000e+00> : vector<16x128xf32>
    %3 = tpu.matmul %0, %1, %cst {dimension_numbers = #tpu.dot_dimension_numbers<[1], [0], [0], [1], [0, 0, 1, 1], [], []>} : vector<16x128xbf16>, vector<128x128xbf16>, vector<16x128xf32> -> vector<16x128xf32>
    %4 = vector.broadcast %2 : vector<1x128xf32> to vector<16x128xf32>
    %5 = arith.addf %3, %4 : vector<16x128xf32>
    %cst_5 = arith.constant 0.000000e+00 : f32
    %6 = vector.broadcast %cst_5 : f32 to vector<16x128xf32>
    %7 = arith.maximumf %5, %6 : vector<16x128xf32>
    %8 = arith.truncf %7 : vector<16x128xf32> to vector<16x128xbf16>
    %c0_6 = arith.constant 0 : index
    %c0_7 = arith.constant 0 : index
    %9 = vector.load %arg4[%c0_6, %c0_7] : memref<128x128xbf16, #tpu.memory_space<vmem>>, vector<128x128xbf16>
    %c0_8 = arith.constant 0 : index
    %c0_9 = arith.constant 0 : index
    %10 = vector.load %arg5[%c0_8, %c0_9] : memref<1x128xf32, #tpu.memory_space<vmem>>, vector<1x128xf32>
    %cst_10 = arith.constant dense<0.000000e+00> : vector<16x128xf32>
    %11 = tpu.matmul %8, %9, %cst_10 {dimension_numbers = #tpu.dot_dimension_numbers<[1], [0], [0], [1], [0, 0, 1, 1], [], []>} : vector<16x128xbf16>, vector<128x128xbf16>, vector<16x128xf32> -> vector<16x128xf32>
    %12 = vector.broadcast %10 : vector<1x128xf32> to vector<16x128xf32>
    %13 = arith.addf %11, %12 : vector<16x128xf32>
    %cst_11 = arith.constant 0.000000e+00 : f32
    %14 = vector.broadcast %cst_11 : f32 to vector<16x128xf32>
    %15 = arith.maximumf %13, %14 : vector<16x128xf32>
    %16 = arith.truncf %15 : vector<16x128xf32> to vector<16x128xbf16>
    %c0_12 = arith.constant 0 : index
    %c0_13 = arith.constant 0 : index
    %17 = vector.load %arg6[%c0_12, %c0_13] : memref<128x128xbf16, #tpu.memory_space<vmem>>, vector<128x128xbf16>
    %c0_14 = arith.constant 0 : index
    %c0_15 = arith.constant 0 : index
    %18 = vector.load %arg7[%c0_14, %c0_15] : memref<1x128xf32, #tpu.memory_space<vmem>>, vector<1x128xf32>
    %cst_16 = arith.constant dense<0.000000e+00> : vector<16x128xf32>
    %19 = tpu.matmul %16, %17, %cst_16 {dimension_numbers = #tpu.dot_dimension_numbers<[1], [0], [0], [1], [0, 0, 1, 1], [], []>} : vector<16x128xbf16>, vector<128x128xbf16>, vector<16x128xf32> -> vector<16x128xf32>
    %20 = vector.broadcast %18 : vector<1x128xf32> to vector<16x128xf32>
    %21 = arith.addf %19, %20 : vector<16x128xf32>
    %c0_17 = arith.constant 0 : index
    %c0_18 = arith.constant 0 : index
    %22 = vector.load %arg8[%c0_17, %c0_18] : memref<16x128xf32, #tpu.memory_space<vmem>>, vector<16x128xf32>
    tpu.vector_store %arg8[%c0_17, %c0_18], %21 {strides = array<i32>} : memref<16x128xf32, #tpu.memory_space<vmem>>, vector<16x128xf32>,
    return
  }
  func.func @transform_0(%arg0: i32) -> (i32, i32) {
    %c0_i32 = arith.constant 0 : i32
    %c0_i32_0 = arith.constant 0 : i32
    return %arg0, %c0_i32 : i32, i32
  }
  func.func @transform_1(%arg0: i32) -> (i32, i32) {
    %c0_i32 = arith.constant 0 : i32
    %c0_i32_0 = arith.constant 0 : i32
    %c0_i32_1 = arith.constant 0 : i32
    return %c0_i32, %c0_i32_0 : i32, i32
  }
  func.func @transform_2(%arg0: i32) -> (i32, i32) {
    %c0_i32 = arith.constant 0 : i32
    %c0_i32_0 = arith.constant 0 : i32
    %c0_i32_1 = arith.constant 0 : i32
    return %c0_i32, %c0_i32_0 : i32, i32
  }
  func.func @transform_3(%arg0: i32) -> (i32, i32) {
    %c0_i32 = arith.constant 0 : i32
    %c0_i32_0 = arith.constant 0 : i32
    %c0_i32_1 = arith.constant 0 : i32
    return %c0_i32, %c0_i32_0 : i32, i32
  }
  func.func @transform_4(%arg0: i32) -> (i32, i32) {
    %c0_i32 = arith.constant 0 : i32
    %c0_i32_0 = arith.constant 0 : i32
    %c0_i32_1 = arith.constant 0 : i32
    return %c0_i32, %c0_i32_0 : i32, i32
  }
  func.func @transform_5(%arg0: i32) -> (i32, i32) {
    %c0_i32 = arith.constant 0 : i32
    %c0_i32_0 = arith.constant 0 : i32
    %c0_i32_1 = arith.constant 0 : i32
    return %c0_i32, %c0_i32_0 : i32, i32
  }
  func.func @transform_6(%arg0: i32) -> (i32, i32) {
    %c0_i32 = arith.constant 0 : i32
    %c0_i32_0 = arith.constant 0 : i32
    %c0_i32_1 = arith.constant 0 : i32
    return %c0_i32, %c0_i32_0 : i32, i32
  }
  func.func @transform_7(%arg0: i32) -> (i32, i32) {
    %c0_i32 = arith.constant 0 : i32
    %c0_i32_0 = arith.constant 0 : i32
    return %arg0, %c0_i32 : i32, i32
  }
}

</mosaic_0001>

<bundles_post_ra>
// kernel: mlp_forward.1
= control target key start
LH: loop header
LB: loop body
LE: loop exit
PB: predicated region body
PF: predicated region fallthrough
CT: control target
= control target key end

     0   :  { %12 = vsyncpa [#allocation3], 0  ;;  %s727_s0 = inlined_call_operand.vmem [shape: bf16[16,128], index: 0, kind: input, shape index: {}]   ;;  %s728_s1 = inlined_call_operand.vmem [shape: bf16[128,128], index: 1, kind: input, shape index: {}]   ;;  %s729_s2 = inlined_call_operand.vmem [shape: f32[1,128], index: 2, kind: input, shape index: {}]   ;;  %s730_s3 = inlined_call_operand.hbm [shape: bf16[128,128], index: 3, kind: input, shape index: {}]   ;;  %s731_s4 = inlined_call_operand.vmem [shape: f32[1,128], index: 4, kind: input, shape index: {}]   ;;  %s732_s5 = inlined_call_operand.hbm [shape: bf16[128,128], index: 5, kind: input, shape index: {}]   ;;  %s733_s6 = inlined_call_operand.vmem [shape: f32[1,128], index: 6, kind: input, shape index: {}]   ;;  %s734_s7 = inlined_call_operand.vmem [shape: f32[16,128], index: 7, kind: output, shape index: {}]  }
   0x1   :  { %13 = vsyncpa [#allocation5], 0  ;;  %s603_s24 = smov [#allocation2]  }
   0x2   :  { %s25_s25 = sshll.u32 %s603_s24, 4  ;;  %s26_s25 = int_to_ptr.vmem [resolvable:$true] %s25_s25 }
   0x3   :  { %s567_s26 = scalar_lea.vmem %s26_s25, 1024  ;;  %p572_p1 = scmp.lt.s32.totalorder %s26_s25, %s26_s25 }
   0x4   :  { %p568_p0 = scmp.ne.s32.totalorder %s26_s25, %s567_s26  ;;  %p573_p2 = scmp.lt.s32.totalorder %s567_s26, %s567_s26 }
   0x6   :  { %p574_p3 = por %p573_p2, %p572_p1 }
   0x8   :  { %p575_p4 = pnand %p574_p3, %p568_p0 }
   0xa   :  { %578 = shalt.err (!%p575_p4)
}
   0xb   :  { %s604_s27 = smov 64   ;;  %s605_s28 = smov 4  }
   0xc   :  { %31 = dma.hbm_to_vmem [thread:$0]  %s730_s3, 1024, %s26_s25, [#allocation3], %s604_s27, %s604_s27, %s605_s28  }
   0xd   :  { %s606_s8 = smov [#allocation4]  }
   0xe   :  { %s39_s9 = sshll.u32 %s606_s8, 4  ;;  %s40_s9 = int_to_ptr.vmem [resolvable:$true] %s39_s9 }
   0xf   :  { %s587_s10 = scalar_lea.vmem %s40_s9, 1024  ;;  %p592_p6 = scmp.lt.s32.totalorder %s40_s9, %s40_s9 }
  0x10   :  { %p588_p5 = scmp.ne.s32.totalorder %s40_s9, %s587_s10  ;;  %p593_p7 = scmp.lt.s32.totalorder %s587_s10, %s587_s10 }
  0x12   :  { %p594_p8 = por %p593_p7, %p592_p6 }
  0x14   :  { %p595_p9 = pnand %p594_p8, %p588_p5 }
  0x16   :  { %598 = shalt.err (!%p595_p9)
}
  0x17   :  { %45 = dma.hbm_to_vmem [thread:$0]  %s732_s5, 1024, %s40_s9, [#allocation5], %s604_s27, %s604_s27, %s605_s28  }
  0x18   :  { %599 = dma.done.wait [#allocation3], 1024  }
  0x19   :  { %600 = vsyncadd [#allocation3], 4294966272 }
  0x1a   :  { %601 = dma.done.wait [#allocation5], 1024  }
  0x1b   :  { %602 = vsyncadd [#allocation5], 4294966272  ;;  %v607_v0 = vmov 0.0   ;;  %vm608_vm0 = vmmov 0   ;;  %v534_v1 = vld [vmem:[%s728_s1 + $0x38] sm:$0xff]   ;;  %v535_v2 = vld [vmem:[%s728_s1 + $0x30] sm:$0xff]  }
  0x1c   :  { %468 = vmatprep.subr.bf16.mxu0 %v607_v0  ;;  %484 = vmatprep.mubr.msk.bf16.mxu0 %vm608_vm0, %v607_v0  ;;  %v536_v3 = vld [vmem:[%s728_s1 + $0x28] sm:$0xff]   ;;  %v543_v4 = vld [vmem:[#allocation2 + $0x38] sm:$0xff]   ;;  %v537_v5 = vld [vmem:[%s728_s1 + $0x20] sm:$0xff]  }
  0x1d   :  { %488 = vmatprep.subr.bf16.mxu1 %v607_v0  ;;  %504 = vmatprep.mubr.msk.bf16.mxu1 %vm608_vm0, %v607_v0  ;;  %v544_v6 = vld [vmem:[#allocation2 + $0x30] sm:$0xff]   ;;  %v538_v7 = vld [vmem:[%s728_s1 + $0x18] sm:$0xff]   ;;  %v545_v8 = vld [vmem:[#allocation2 + $0x28] sm:$0xff]  }
  0x1e   :  { %469 = vmatpush3.bf16.msra.mxu0 %v534_v1  ;;  %489 = vmatpush3.bf16.msra.mxu1 %v543_v4  ;;  %v539_v9 = vld [vmem:[%s728_s1 + $0x10] sm:$0xff]   ;;  %v546_v10 = vld [vmem:[#allocation2 + $0x20] sm:$0xff]   ;;  %v540_v11 = vld [vmem:[%s728_s1 + $0x8] sm:$0xff]  }
  0x1f   :  { %470 = vmatprep.subr.bf16.mxu0 %v607_v0  ;;  %490 = vmatprep.subr.bf16.mxu1 %v607_v0  ;;  %v547_v12 = vld [vmem:[#allocation2 + $0x18] sm:$0xff]   ;;  %v541_v13 = vld [vmem:[%s728_s1] sm:$0xff]   ;;  %v548_v15 = vld [vmem:[#allocation2 + $0x10] sm:$0xff]  }
  0x20   :  { %v542_v14 = vld [vmem:[%s727_s0] sm:$0xff]   ;;  %v549_v16 = vld [vmem:[#allocation2 + $0x8] sm:$0xff]   ;;  %v551_v18 = vld [vmem:[#allocation4 + $0x38] sm:$0xff]  }
  0x21   :  { %v550_v17 = vld [vmem:[#allocation2] sm:$0xff]   ;;  %v552_v19 = vld [vmem:[#allocation4 + $0x30] sm:$0xff]   ;;  %v553_v20 = vld [vmem:[#allocation4 + $0x28] sm:$0xff]  }
  0x22   :  { %471 = vmatpush3.bf16.msra.mxu0 %v535_v2  ;;  %491 = vmatpush3.bf16.msra.mxu1 %v544_v6  ;;  %v554_v21 = vld [vmem:[#allocation4 + $0x20] sm:$0xff]   ;;  %v555_v22 = vld [vmem:[#allocation4 + $0x18] sm:$0xff]   ;;  %v556_v33 = vld [vmem:[#allocation4 + $0x10] sm:$0xff]  }
  0x23   :  { %472 = vmatprep.subr.bf16.mxu0 %v607_v0  ;;  %492 = vmatprep.subr.bf16.mxu1 %v607_v0  ;;  %v413_v23 = vld [vmem:[%s729_s2] ss:$0 sm:$0xff]  ;;  %v557_v34 = vld [vmem:[#allocation4 + $0x8] sm:$0xff]  }
  0x24   :  { %v558_v35 = vld [vmem:[#allocation4] sm:$0xff]  }
  0x25   :  { %v423_v36 = vld [vmem:[%s731_s4] ss:$0 sm:$0xff] }
  0x26   :  { %473 = vmatpush3.bf16.msra.mxu0 %v536_v3  ;;  %493 = vmatpush3.bf16.msra.mxu1 %v545_v8  ;;  %v432_v46 = vld [vmem:[%s733_s6] ss:$0 sm:$0xff] }
  0x27   :  { %474 = vmatprep.subr.bf16.mxu0 %v607_v0  ;;  %494 = vmatprep.subr.bf16.mxu1 %v607_v0 }
  0x2a   :  { %475 = vmatpush3.bf16.msra.mxu0 %v537_v5  ;;  %495 = vmatpush3.bf16.msra.mxu1 %v546_v10 }
  0x2b   :  { %476 = vmatprep.subr.bf16.mxu0 %v607_v0  ;;  %496 = vmatprep.subr.bf16.mxu1 %v607_v0 }
  0x2e   :  { %477 = vmatpush3.bf16.msra.mxu0 %v538_v7  ;;  %497 = vmatpush3.bf16.msra.mxu1 %v547_v12 }
  0x2f   :  { %478 = vmatprep.subr.bf16.mxu0 %v607_v0  ;;  %498 = vmatprep.subr.bf16.mxu1 %v607_v0 }
  0x32   :  { %479 = vmatpush3.bf16.msra.mxu0 %v539_v9  ;;  %499 = vmatpush3.bf16.msra.mxu1 %v548_v15 }
  0x33   :  { %480 = vmatprep.subr.bf16.mxu0 %v607_v0  ;;  %500 = vmatprep.subr.bf16.mxu1 %v607_v0 }
  0x36   :  { %481 = vmatpush3.bf16.msra.mxu0 %v540_v11  ;;  %501 = vmatpush3.bf16.msra.mxu1 %v549_v16 }
  0x37   :  { %482 = vmatprep.subr.bf16.mxu0 %v607_v0  ;;  %502 = vmatprep.subr.bf16.mxu1 %v607_v0 }
  0x3a   :  { %483 = vmatpush3.bf16.msra.mxu0 %v541_v13  ;;  %503 = vmatpush3.bf16.msra.mxu1 %v550_v17 }
  0x3b   :  { %508 = vmatprep.subr.bf16.mxu0 %v607_v0 }
  0x3d   :  { %485 = vmatmul.mubr.bf16.vlgmr.msra.gmra.mxu0 %v542_v14 }
  0x3e   :  { %524 = vmatprep.mubr.msk.bf16.mxu0 %vm608_vm0, %v607_v0  ;;  %509 = vmatpush3.bf16.msra.mxu0 %v551_v18 }
  0x3f   :  { %510 = vmatprep.subr.bf16.mxu0 %v607_v0 }
  0x42   :  { %511 = vmatpush3.bf16.msra.mxu0 %v552_v19 }
  0x43   :  { %512 = vmatprep.subr.bf16.mxu0 %v607_v0 }
  0x46   :  { %513 = vmatpush3.bf16.msra.mxu0 %v553_v20 }
  0x47   :  { %514 = vmatprep.subr.bf16.mxu0 %v607_v0 }
  0x4a   :  { %515 = vmatpush3.bf16.msra.mxu0 %v554_v21 }
  0x4b   :  { %516 = vmatprep.subr.bf16.mxu0 %v607_v0 }
  0x4e   :  { %517 = vmatpush3.bf16.msra.mxu0 %v555_v22 }
  0x4f   :  { %518 = vmatprep.subr.bf16.mxu0 %v607_v0 }
  0x52   :  { %519 = vmatpush3.bf16.msra.mxu0 %v556_v33 }
  0x53   :  { %520 = vmatprep.subr.bf16.mxu0 %v607_v0 }
  0x56   :  { %521 = vmatpush3.bf16.msra.mxu0 %v557_v34 }
  0x57   :  { %522 = vmatprep.subr.bf16.mxu0 %v607_v0 }
  0x5a   :  { %523 = vmatpush3.bf16.msra.mxu0 %v558_v35 }
  0xfd   :  { %v168_v24 = vpop.f32.mrf.mxu0 }
  0xfe   :  { %v169_v26 = vadd.f32 %v413_v23, %v168_v24 }
  0xff   :  { %v486_v25 = vpop.f32.mrf.mxu0 }
 0x100   :  { %v175_v30 = vmax.f32 %v169_v26, 0.0 }
 0x101   :  { %v171_v27 = vpop.f32.mrf.mxu0 }
 0x102   :  { %v172_v28 = vadd.f32 %v413_v23, %v171_v27 }
 0x103   :  { %v487_v29 = vpop.f32.mrf.mxu0 }
 0x104   :  { %v176_v31 = vmax.f32 %v172_v28, 0.0 }
 0x106   :  { %v177_v32 = vpack.c.bf16 %v176_v31, %v175_v30 }
 0x108   :  { %505 = vmatmul.mubr.bf16.vlgmr.msra.gmra.mxu1 %v177_v32 }
 0x1c8   :  { %v283_v37 = vpop.f32.mrf.mxu1 }
 0x1c9   :  { %v284_v39 = vadd.f32 %v423_v36, %v283_v37 }
 0x1ca   :  { %v506_v38 = vpop.f32.mrf.mxu1 }
 0x1cb   :  { %v290_v43 = vmax.f32 %v284_v39, 0.0 }
 0x1cc   :  { %v286_v40 = vpop.f32.mrf.mxu1 }
 0x1cd   :  { %v287_v41 = vadd.f32 %v423_v36, %v286_v40 }
 0x1ce   :  { %v507_v42 = vpop.f32.mrf.mxu1 }
 0x1cf   :  { %v291_v44 = vmax.f32 %v287_v41, 0.0 }
 0x1d1   :  { %v292_v45 = vpack.c.bf16 %v291_v44, %v290_v43 }
 0x1d3   :  { %525 = vmatmul.mubr.bf16.vlgmr.msra.gmra.mxu0 %v292_v45 }
 0x293   :  { %v398_v47 = vpop.f32.mrf.mxu0 }
 0x294   :  { %v399_v48 = vadd.f32 %v432_v46, %v398_v47 }
 0x295   :  { %v526_v49 = vpop.f32.mrf.mxu0 }
 0x296   :  { %405 = vst [vmem:[%s734_s7] sm:$0xff] %v399_v48 }
 0x297   :  { %v401_v50 = vpop.f32.mrf.mxu0 }
 0x298   :  { %v402_v51 = vadd.f32 %v432_v46, %v401_v50 }
 0x299   :  { %v527_v52 = vpop.f32.mrf.mxu0 }
 0x29a   :  { %406 = vst [vmem:[%s734_s7 + $0x8] sm:$0xff] %v402_v51 }
 0x29b   :  { %411 = vsyncpa [#allocation3], 1 }
 0x29c   :  { %412 = vsyncpa [#allocation5], 1 }

</bundles_post_ra>
